<compile_context>
chip_gen: v7x
topology: tpu7x:2x2x1
jax: 0.10.0
libtpu: 0.0.40
codegen_flags: <defaults>
</compile_context>

<pallas_src>
import functools

import jax
import jax.numpy as jnp
from jax.scipy.linalg import block_diag
from jax.experimental import pallas as pl
from jax.experimental.pallas import tpu as pltpu

HEAD_SIZE = 32
CHUNK = 16          # wkv7 chunk length (serial chain is T / CHUNK)
SCAN_FORWARD = 0
SCAN_BACKWARD = 1
SCAN_UPWARD = 2
SCAN_DOWNWARD = 3


def _round_up(x, m):
    return (x + m - 1) // m * m


def _tile_rows(dim, cap=256):
    """Row (sublane) tile: full dim if small, else a multiple-of-8 divisor, else pad."""
    if dim <= cap:
        return dim, dim
    for t in range(cap, 7, -8):
        if dim % t == 0:
            return t, dim
    return cap, _round_up(dim, cap)


def _tile_lanes(dim, cap):
    """Lane tile: full dim if small, else a multiple-of-128 divisor, else pad."""
    if dim <= cap:
        return dim, dim
    for t in range(cap, 127, -128):
        if dim % t == 0:
            return t, dim
    t = min(cap, 512)
    return t, _round_up(dim, t)


# ----------------------------------------------------------------------------
# Tiled bf16 matmul (used for every linear / LoRA projection)
# ----------------------------------------------------------------------------
def _matmul_kernel(a_ref, b_ref, o_ref, acc_ref):
    @pl.when(pl.program_id(2) == 0)
    def _():
        acc_ref[...] = jnp.zeros_like(acc_ref)

    acc_ref[...] += jnp.dot(a_ref[...], b_ref[...],
                            preferred_element_type=jnp.float32)

    @pl.when(pl.program_id(2) == pl.num_programs(2) - 1)
    def _():
        o_ref[...] = acc_ref[...].astype(o_ref.dtype)


def pallas_matmul(a, b, out_dtype=jnp.float32):
    """a (M,K) @ b (K,N) -> (M,N).  bf16 operands, fp32 accumulation."""
    M, K = a.shape
    K2, N = b.shape
    assert K == K2
    if a.dtype != jnp.bfloat16:
        a = a.astype(jnp.bfloat16)
    if b.dtype != jnp.bfloat16:
        b = b.astype(jnp.bfloat16)
    tm, Mp = _tile_rows(M, 256)
    tk, Kp = _tile_lanes(K, 1024)
    tn, Np = _tile_lanes(N, 256)
    if (Mp, Kp) != (M, K):
        a = jnp.pad(a, ((0, Mp - M), (0, Kp - K)))
    if (Kp, Np) != (K, N):
        b = jnp.pad(b, ((0, Kp - K), (0, Np - N)))
    out = pl.pallas_call(
        _matmul_kernel,
        out_shape=jax.ShapeDtypeStruct((Mp, Np), out_dtype),
        grid=(Mp // tm, Np // tn, Kp // tk),
        in_specs=[pl.BlockSpec((tm, tk), lambda i, j, k: (i, k)),
                  pl.BlockSpec((tk, tn), lambda i, j, k: (k, j))],
        out_specs=pl.BlockSpec((tm, tn), lambda i, j, k: (i, j)),
        scratch_shapes=[pltpu.VMEM((tm, tn), jnp.float32)],
        compiler_params=pltpu.CompilerParams(
            dimension_semantics=("parallel", "parallel", "arbitrary")),
    )(a, b)
    if (Mp, Np) != (M, N):
        out = out[:M, :N]
    return out


def linear(x, w, out_dtype=jnp.float32):
    """x: (..., in) @ w: (in, out) -> (..., out)  (weights stored transposed)."""
    lead = x.shape[:-1]
    y = pallas_matmul(x.reshape(-1, x.shape[-1]), w, out_dtype)
    return y.reshape(*lead, w.shape[-1])


# ----------------------------------------------------------------------------
# Chunked RWKV7 recurrence with fused ln_x GroupNorm + bonus term
#
# Per head (value index i, key index j):
#   S_t = S_{t-1} * diag(d_t) + (S_{t-1} a_t^T) b_t + v_t^T k_t ,  d_t = exp(-exp(w_t))
#   y_t = S_t r_t^T
# Chunked (WY / UT-transform) form, exact reassociation of the above:
#   lam_t  = prod_{s<=t} d_s ;  ahat=a*lam_{t-1}, bhat=b/lam_t, khat=k/lam_t, rhat=r*lam_t
#   A_ab = strict_tril(ahat bhat^T), A_ak = strict_tril(ahat khat^T)
#   Tm   = (I - A_ab)^{-1}  (nilpotent -> doubling expansion)
#   W = Tm ahat ; U = Tm (A_ak V)
#   Y = (rhat + tril(rhat bhat^T) W) S0^T + tril(rhat khat^T) V + tril(rhat bhat^T) U
#   S_L = S0*lam_L + (S0 W^T + U^T)(b*lam_L/lam) + V^T (k*lam_L/lam)
# ----------------------------------------------------------------------------
def _wkv7_chunk_kernel(r_ref, w_ref, k_ref, v_ref, a_ref, b_ref,
                       gw_ref, gb_ref, fa_ref, o_ref, s_ref, *, eps):
    P, L, N = r_ref.shape
    f32 = jnp.float32

    @pl.when(pl.program_id(1) == 0)
    def _():
        s_ref[...] = jnp.zeros_like(s_ref)

    r = r_ref[...].astype(f32)
    w = w_ref[...].astype(f32)
    k = k_ref[...].astype(f32)
    v = v_ref[...].astype(f32)
    a = a_ref[...].astype(f32)
    b = b_ref[...].astype(f32)

    # batched matmul helpers, batch dim 0
    def bmm(x, y):      # (P,I,J) @ (P,J,K) -> (P,I,K)
        return jax.lax.dot_general(x, y, (((2,), (1,)), ((0,), (0,))),
                                   preferred_element_type=f32)

    def bmm_nt(x, y):   # (P,I,J) @ (P,K,J)^T -> (P,I,K)
        return jax.lax.dot_general(x, y, (((2,), (2,)), ((0,), (0,))),
                                   preferred_element_type=f32)

    def bmm_tn(x, y):   # (P,J,I)^T @ (P,J,K) -> (P,I,K)
        return jax.lax.dot_general(x, y, (((1,), (1,)), ((0,), (0,))),
                                   preferred_element_type=f32)

    row = jax.lax.broadcasted_iota(jnp.int32, (L, L), 0)
    col = jax.lax.broadcasted_iota(jnp.int32, (L, L), 1)
    incl = (row >= col).astype(f32)      # inclusive lower triangular
    strict = (row > col).astype(f32)     # strictly lower triangular
    eye = (row == col).astype(f32)

    # cumulative log-decay (inclusive) as a small triangular matmul
    logd = -jnp.exp(w)                                         # (P,L,N), <= 0
    G = bmm(jnp.broadcast_to(incl, (P, L, L)), logd)           # inclusive cumsum over t
    Gm1 = G - logd                                             # exclusive cumsum
    GL = G[:, L - 1:L, :]                                      # (P,1,N)

    ahat = a * jnp.exp(Gm1)
    bhat = b * jnp.exp(-G)          # bounded: w <= -0.5 in RWKV7 so exp(-G) <= e^{~10}
    khat = k * jnp.exp(-G)
    rhat = r * jnp.exp(G)
    btil = b * jnp.exp(GL - G)      # decay-to-chunk-end scaling (<= 1)
    ktil = k * jnp.exp(GL - G)

    A_ab = bmm_nt(ahat, bhat) * strict                         # (P,L,L)
    A_ak = bmm_nt(ahat, khat) * strict
    A_rb = bmm_nt(rhat, bhat) * incl
    A_rk = bmm_nt(rhat, khat) * incl

    # Tm = (I - A_ab)^{-1}: A_ab is strictly lower (nilpotent) -> doubling expansion
    Tm = A_ab + eye
    Mp = A_ab
    cover = 2
    while cover < L:
        Mp = bmm(Mp, Mp)
        Tm = Tm + bmm(Tm, Mp)
        cover *= 2

    W = bmm(Tm, ahat)                                          # (P,L,N)
    U = bmm(Tm, bmm(A_ak, v))                                  # (P,L,N)

    S0 = s_ref[...]                                            # (P, N_v, N_k)
    Rp = rhat + bmm(A_rb, W)
    Y = bmm_nt(Rp, S0) + bmm(A_rk, v) + bmm(A_rb, U)           # (P,L,N_v)

    # carry state to the next chunk
    s_ref[...] = (S0 * jnp.exp(GL)
                  + bmm(S0, bmm_tn(W, btil))
                  + bmm_tn(U, btil)
                  + bmm_tn(v, ktil))

    # fused ln_x: per-head GroupNorm over the N channels at every position
    mean = jnp.mean(Y, axis=-1, keepdims=True)
    yc = Y - mean
    var = jnp.mean(yc * yc, axis=-1, keepdims=True)
    yn = yc * jax.lax.rsqrt(var + eps) * gw_ref[...] + gb_ref[...]

    # fused bonus term: sum_j(r*k*faaaa) * v  (per head, per position)
    bonus = jnp.sum(r * k * fa_ref[...], axis=-1, keepdims=True) * v

    o_ref[...] = (yn + bonus).astype(o_ref.dtype)


def wkv7_ln_bonus(r, w, k, v, a, b, gn_w, gn_b, faaaa, n_head,
                  eps=6.4e-5, chunk=CHUNK):
    """Equivalent of the CUDA `attn` kernel followed by nn.GroupNorm(n_head, C,
    eps=6.4e-05) plus the rwkv7 bonus term.  r/w/k/v/a/b are cast to bf16 (as in
    the reference); decay is computed in-kernel from bf16 w.
    NOTE: eps=6.4e-5 matches this module's spec (nn.GroupNorm(..., eps=6.4e-05))."""
    B, T, C = r.shape
    N = HEAD_SIZE
    H = n_head
    BH = B * H
    Tp = _round_up(T, chunk)

    def prep(t):
        t = t.astype(jnp.bfloat16).reshape(B, T, H, N)
        t = t.transpose(0, 2, 1, 3).reshape(BH, T, N)
        if Tp != T:
            t = jnp.pad(t, ((0, 0), (0, Tp - T), (0, 0)))
        return t

    rr, ww, kk, vv, aa, bb = (prep(t) for t in (r, w, k, v, a, b))

    gw = jnp.tile(gn_w.reshape(H, N).astype(jnp.float32), (B, 1)).reshape(BH, 1, N)
    gb = jnp.tile(gn_b.reshape(H, N).astype(jnp.float32), (B, 1)).reshape(BH, 1, N)
    fa = jnp.tile(faaaa.reshape(H, N).astype(jnp.float32), (B, 1)).reshape(BH, 1, N)

    # pack heads (mixed with batch) per grid step; every (b, h) row is independent
    P = next(p for p in (8, 4, 2, 1) if BH % p == 0)

    io_spec = pl.BlockSpec((P, chunk, N), lambda g, c: (g, c, 0))
    par_spec = pl.BlockSpec((P, 1, N), lambda g, c: (g, 0, 0))

    out = pl.pallas_call(
        functools.partial(_wkv7_chunk_kernel, eps=eps),
        out_shape=jax.ShapeDtypeStruct((BH, Tp, N), jnp.float32),
        grid=(BH // P, Tp // chunk),
        in_specs=[io_spec] * 6 + [par_spec] * 3,
        out_specs=io_spec,
        scratch_shapes=[pltpu.VMEM((P, N, N), jnp.float32)],
        compiler_params=pltpu.CompilerParams(
            dimension_semantics=("parallel", "arbitrary")),
    )(rr, ww, kk, vv, aa, bb, gw, gb, fa)

    out = out[:, :T, :].reshape(B, H, T, N).transpose(0, 2, 1, 3).reshape(B, T, C)
    return out


def wkv7_ln_bonus_ref(r, w, k, v, a, b, gn_w, gn_b, faaaa, n_head, eps=6.4e-5):
    """Pure-JAX sequential reference of the recurrence + GroupNorm + bonus (for tests)."""
    B, T, C = r.shape
    N = HEAD_SIZE
    H = n_head

    def cast4(t):
        return t.astype(jnp.bfloat16).astype(jnp.float32).reshape(B, T, H, N)

    r4, w4, k4, v4, a4, b4 = (cast4(t) for t in (r, w, k, v, a, b))
    d4 = jnp.exp(-jnp.exp(w4))
    seq = tuple(jnp.moveaxis(t, 1, 0) for t in (r4, d4, k4, v4, a4, b4))
    S0 = jnp.zeros((B, H, N, N), jnp.float32)          # [..., v_idx, k_idx]

    def step(S, inp):
        rt, dt, kt, vt, at, bt = inp
        sa = jnp.einsum('bhvk,bhk->bhv', S, at)
        S = (S * dt[:, :, None, :]
             + sa[..., None] * bt[:, :, None, :]
             + vt[..., None] * kt[:, :, None, :])
        y = jnp.einsum('bhvk,bhk->bhv', S, rt)
        return S, y

    _, ys = jax.lax.scan(step, S0, seq)
    y = jnp.moveaxis(ys, 0, 1)                          # (B,T,H,N)
    mean = jnp.mean(y, axis=-1, keepdims=True)
    var = jnp.mean((y - mean) ** 2, axis=-1, keepdims=True)
    yn = (y - mean) * jax.lax.rsqrt(var + eps) * gn_w.reshape(1, 1, H, N) \
        + gn_b.reshape(1, 1, H, N)
    bonus = jnp.sum(r4 * k4 * faaaa.reshape(1, 1, H, N), axis=-1, keepdims=True) * v4
    return (yn + bonus).reshape(B, T, C)


# ----------------------------------------------------------------------------
# Channel mix (MLP) — spatial-mix interpolation fused in, bf16 MXU, fp32 accum
# ----------------------------------------------------------------------------
def _cmix_kernel(x_ref, xx_ref, mk_ref, mr_ref, wk_ref, wv_ref, wr_ref,
                 o_ref, acc_ref):
    h = pl.program_id(1)

    @pl.when(h == 0)
    def _():
        acc_ref[...] = jnp.zeros_like(acc_ref)

    x = x_ref[...].astype(jnp.float32)
    xx = xx_ref[...].astype(jnp.float32)
    mk = mk_ref[...]
    xk = (x * mk + xx * (1.0 - mk)).astype(jnp.bfloat16)
    kh = jnp.dot(xk, wk_ref[...], preferred_element_type=jnp.float32)
    kh = jnp.square(jnp.maximum(kh, 0.0)).astype(jnp.bfloat16)
    acc_ref[...] += jnp.dot(kh, wv_ref[...], preferred_element_type=jnp.float32)

    @pl.when(h == pl.num_programs(1) - 1)
    def _():
        mr = mr_ref[...]
        xr = (x * mr + xx * (1.0 - mr)).astype(jnp.bfloat16)
        rr = jax.nn.sigmoid(jnp.dot(xr, wr_ref[...],
                                    preferred_element_type=jnp.float32))
        o_ref[...] = (rr * acc_ref[...]).astype(o_ref.dtype)


def channel_mix(p, x, res):
    B, T, C = x.shape
    xx = q_shift_multihead(x, 1, res)
    M = B * T
    hidden = p['mlp_key_w'].shape[1]

    x2 = x.reshape(M, C).astype(jnp.bfloat16)
    xx2 = xx.reshape(M, C).astype(jnp.bfloat16)

    # tile caps kept small enough for v5e's 16 MiB default scoped VMEM
    tm_cap = 256 if C <= 1024 else 128
    th_cap = 512 if C <= 1024 else 256
    tm, Mp = _tile_rows(M, tm_cap)
    th, Hp = _tile_lanes(hidden, th_cap)
    if Mp != M:
        x2 = jnp.pad(x2, ((0, Mp - M), (0, 0)))
        xx2 = jnp.pad(xx2, ((0, Mp - M), (0, 0)))
    wk = p['mlp_key_w'].astype(jnp.bfloat16)
    wv = p['mlp_value_w'].astype(jnp.bfloat16)
    wr = p['mlp_recept_w'].astype(jnp.bfloat16)
    if Hp != hidden:
        wk = jnp.pad(wk, ((0, 0), (0, Hp - hidden)))
        wv = jnp.pad(wv, ((0, Hp - hidden), (0, 0)))
    mk = p['spatial_mix_k'].reshape(1, C).astype(jnp.float32)
    mr = p['spatial_mix_r'].reshape(1, C).astype(jnp.float32)

    out = pl.pallas_call(
        _cmix_kernel,
        out_shape=jax.ShapeDtypeStruct((Mp, C), jnp.float32),
        grid=(Mp // tm, Hp // th),
        in_specs=[pl.BlockSpec((tm, C), lambda i, h: (i, 0)),
                  pl.BlockSpec((tm, C), lambda i, h: (i, 0)),
                  pl.BlockSpec((1, C), lambda i, h: (0, 0)),
                  pl.BlockSpec((1, C), lambda i, h: (0, 0)),
                  pl.BlockSpec((C, th), lambda i, h: (0, h)),
                  pl.BlockSpec((th, C), lambda i, h: (h, 0)),
                  pl.BlockSpec((C, C), lambda i, h: (0, 0))],
        out_specs=pl.BlockSpec((tm, C), lambda i, h: (i, 0)),
        scratch_shapes=[pltpu.VMEM((tm, C), jnp.float32)],
        compiler_params=pltpu.CompilerParams(
            dimension_semantics=("parallel", "arbitrary")),
    )(x2, xx2, mk, mr, wk, wv, wr)
    if Mp != M:
        out = out[:M]
    return out.reshape(B, T, C)


# ----------------------------------------------------------------------------
# Plain-JAX glue (token shift, LayerNorm) — fused by XLA
# ----------------------------------------------------------------------------
def q_shift_multihead(x, shift_pixel, patch_resolution, head_dim=HEAD_SIZE):
    B, T, C = x.shape
    Hr, Wr = patch_resolution
    q = head_dim // 4
    s = shift_pixel
    xi = x.reshape(B, Hr, Wr, C // head_dim, head_dim)

    def shift(a, axis, amt):
        pad = [(0, 0)] * a.ndim
        sl = [slice(None)] * a.ndim
        if amt > 0:
            pad[axis] = (amt, 0)
            sl[axis] = slice(0, a.shape[axis])
        else:
            pad[axis] = (0, -amt)
            sl[axis] = slice(-amt, a.shape[axis] - amt)
        return jnp.pad(a, pad)[tuple(sl)]

    c0 = shift(xi[..., 0:q], axis=2, amt=s)            # right along W
    c1 = shift(xi[..., q:2 * q], axis=2, amt=-s)       # left along W
    c2 = shift(xi[..., 2 * q:3 * q], axis=1, amt=s)    # down along H
    c3 = shift(xi[..., 3 * q:4 * q], axis=1, amt=-s)   # up along H
    return jnp.concatenate([c0, c1, c2, c3], axis=-1).reshape(B, T, C)


def layernorm(x, w, b, eps=1e-5):
    mu = jnp.mean(x, axis=-1, keepdims=True)
    xc = x - mu
    var = jnp.mean(xc * xc, axis=-1, keepdims=True)
    return xc * jax.lax.rsqrt(var + eps) * w + b


# ----------------------------------------------------------------------------
# RWKV7 attention (spatial mix) with fused projections
# ----------------------------------------------------------------------------
def rwkv7_attention_inner(p, x, v1, res, layer_id, n_head):
    B, T, C = x.shape
    H, N = n_head, HEAD_SIZE
    bf16 = jnp.bfloat16

    xx = q_shift_multihead(x, 1, res) - x

    # token-mix LoRA: one matmul in, one block-diagonal matmul out (4 bmm's fused)
    xxx = jnp.tanh(linear((x + xx * p['time_maa_x']).astype(bf16), p['time_maa_w1']))
    w2_bd = block_diag(*[p['time_maa_w2'][i] for i in range(4)])         # (112, 4C)
    mixed = linear(xxx.astype(bf16), w2_bd)                              # (B,T,4C)
    m_rg, m_wa = mixed[..., 0:C], mixed[..., C:2 * C]
    m_k, m_v = mixed[..., 2 * C:3 * C], mixed[..., 3 * C:4 * C]
    xrg = (x + xx * (p['time_maa_rg'] + m_rg)).astype(bf16)
    xwa = (x + xx * (p['time_maa_wa'] + m_wa)).astype(bf16)
    xk = (x + xx * (p['time_maa_k'] + m_k)).astype(bf16)
    xv = (x + xx * (p['time_maa_v'] + m_v)).astype(bf16)

    # fused stage-1 projections (weights concatenated along the output axis)
    rg = linear(xrg, jnp.concatenate([p['receptance_w'], p['gate_w1']], axis=1),
                out_dtype=bf16)
    r, g_lora = rg[..., :C], rg[..., C:].astype(jnp.float32)

    kcat = linear(xk, jnp.concatenate(
        [p['key_w'], p['time_kkk_w1'], p['mk_w1']], axis=1))
    k, kkk_lora, mk_lora = kcat[..., :C], kcat[..., C:C + 24], kcat[..., C + 24:C + 48]

    if layer_id != 0:
        vcat = linear(xv, jnp.concatenate([p['value_w'], p['mv_w1']], axis=1))
        v, mv_lora = vcat[..., :C], vcat[..., C:C + 24]
    else:
        v = linear(xv, p['value_w'])
        mv_lora = None

    wcat = linear(xwa, jnp.concatenate(
        [p['time_decay_w1'], p['time_aaa_w1'], p['ma_w1']], axis=1))
    dec_lora, aaa_lora, ma_lora = wcat[..., :64], wcat[..., 64:88], wcat[..., 88:112]

    # fused stage-2 for the 24-wide LoRAs via one block-diagonal weight
    small_in = [jnp.tanh(kkk_lora), mk_lora, aaa_lora, ma_lora]
    small_w = [p['time_kkk_w2'], p['mk_w2'], p['time_aaa_w2'], p['ma_w2']]
    if layer_id != 0:
        small_in.append(mv_lora)
        small_w.append(p['mv_w2'])
    sm = linear(jnp.concatenate(small_in, axis=-1).astype(bf16), block_diag(*small_w))
    kk_delta, mk_out = sm[..., 0:C], sm[..., C:2 * C]
    aaa_out, ma_out = sm[..., 2 * C:3 * C], sm[..., 3 * C:4 * C]
    mv_out = sm[..., 4 * C:5 * C] if layer_id != 0 else None

    w = -jax.nn.softplus(-(p['time_decay'] +
                           linear(jnp.tanh(dec_lora).astype(bf16),
                                  p['time_decay_w2']))) - 0.5
    g = linear(jax.nn.sigmoid(g_lora).astype(bf16), p['gate_w2'])

    if layer_id == 0:
        v1_out = v
    else:
        v1_out = v1
        v = v + (v1 - v) * jax.nn.sigmoid(p['time_misc_v'] + mv_out)

    kk = k + kk_delta
    kk4 = kk.reshape(B, T, H, N)
    norm = jnp.sqrt(jnp.sum(kk4 * kk4, axis=-1, keepdims=True))
    kk = (kk4 / jnp.maximum(norm, 1e-12)).reshape(B, T, C)

    a_gate = jax.nn.sigmoid(p['time_aaaaa'] + aaa_out)
    ma_g = jax.nn.sigmoid(p['time_misc_a'] + ma_out)
    k = k * ma_g + k * a_gate * (1.0 - ma_g)
    mk_g = jax.nn.sigmoid(p['time_misc_k'] + mk_out)
    k = k * jnp.exp(jnp.minimum(w * mk_g, 0.0))

    # chunked recurrence + fused ln_x GroupNorm + fused bonus term
    x_attn = wkv7_ln_bonus(r, w, k, v, -kk, kk * a_gate,
                           p['ln_x_w'], p['ln_x_b'], p['time_faaaa'], H)

    out = linear((x_attn * g).astype(bf16), p['output_w'])
    return out, v1_out


def rwkv7_attention(p, x, v1, res, scan_list, layer_id, n_head):
    scan = scan_list[layer_id % len(scan_list)]
    B, T, C = x.shape
    h, w = res

    def trans(t):     # 'b (h w) c -> b (w h) c'
        return t.reshape(B, h, w, C).transpose(0, 2, 1, 3).reshape(B, w * h, C)

    def restore(t):   # 'b (w h) c -> b (h w) c'
        return t.reshape(B, w, h, C).transpose(0, 2, 1, 3).reshape(B, h * w, C)

    fwd = lambda xx, vv, rr: rwkv7_attention_inner(p, xx, vv, rr, layer_id, n_head)

    if scan == SCAN_FORWARD:
        x, v1 = fwd(x, v1, res)
    elif scan == SCAN_BACKWARD:
        x = jnp.flip(x, axis=1)
        v1 = jnp.flip(v1, axis=1) if v1 is not None else None
        x, v1 = fwd(x, v1, res)
        x, v1 = jnp.flip(x, axis=1), jnp.flip(v1, axis=1)
    elif scan == SCAN_DOWNWARD:
        x = trans(x)
        v1 = trans(v1) if v1 is not None else None
        x, v1 = fwd(x, v1, (w, h))
        x, v1 = restore(x), restore(v1)
    elif scan == SCAN_UPWARD:
        x = jnp.flip(trans(x), axis=1)
        v1 = jnp.flip(trans(v1), axis=1) if v1 is not None else None
        x, v1 = fwd(x, v1, (w, h))
        x, v1 = restore(jnp.flip(x, axis=1)), restore(jnp.flip(v1, axis=1))
    return x, v1


# ----------------------------------------------------------------------------
# Full block
# ----------------------------------------------------------------------------
def rwkv7_block_forward(p, x, v1, x0, res, scan, layer_id, n_head):
    x = p['lambdas'][0] * x + p['lambdas'][1] * x0
    x1, v1 = rwkv7_attention(p, layernorm(x, p['ln1_w'], p['ln1_b']),
                             v1, res, scan, layer_id, n_head)
    x = x + x1
    x = x + channel_mix(p, layernorm(x, p['ln2_w'], p['ln2_b']), res)
    return x, v1


# ----------------------------------------------------------------------------
# Deterministic synthetic parameter init (matches PyTorch __init__ shapes)
# ----------------------------------------------------------------------------
def init_params(key, n_embd, n_head, n_layer, layer_id):
    C, H, N = n_embd, n_head, HEAD_SIZE
    keys = iter(jax.random.split(key, 64))

    def rnd(shape, scale=0.02):
        return jax.random.normal(next(keys), shape, dtype=jnp.float32) * scale

    ratio_0_to_1 = layer_id / (n_layer - 1)
    ratio_1_to_almost0 = 1.0 - layer_id / n_layer
    ddd = jnp.arange(C, dtype=jnp.float32) / C

    p = {}
    p['time_maa_x'] = (1.0 - jnp.power(ddd, 0.6 * ratio_1_to_almost0 ** 0.9)).reshape(1, 1, C)
    p['time_maa_rg'] = (1.0 - jnp.power(ddd, 0.2 * ratio_1_to_almost0)).reshape(1, 1, C)
    p['time_maa_wa'] = (1.0 - jnp.power(ddd, 0.9 * ratio_1_to_almost0)).reshape(1, 1, C)
    p['time_maa_k'] = (1.0 - (jnp.power(ddd, 0.9 * ratio_1_to_almost0) + 0.4 * ratio_0_to_1)).reshape(1, 1, C)
    p['time_maa_v'] = (1.0 - (jnp.power(ddd, 0.4 * ratio_1_to_almost0) + 0.6 * ratio_0_to_1)).reshape(1, 1, C)
    n_idx = jnp.arange(C, dtype=jnp.float32)
    decay_speed = -7.0 + 5.0 * (n_idx / (C - 1)) ** (0.85 + 1.0 * ratio_0_to_1 ** 0.5)
    p['time_decay'] = decay_speed.reshape(1, 1, C) + 0.5
    p['time_faaaa'] = rnd((1, 1, H, N))
    p['time_aaaaa'] = rnd((1, 1, C))
    # TODO(synk): orthogonal init of the *_w2 LoRA weights replaced by scaled normal (shapes match).
    p['time_maa_w1'] = rnd((C, 28 * 4))
    p['time_maa_w2'] = rnd((4, 28, C), 0.1)
    p['time_decay_w1'] = rnd((C, 64));  p['time_decay_w2'] = rnd((64, C), 0.1)
    p['time_aaa_w1'] = rnd((C, 24));    p['time_aaa_w2'] = rnd((24, C), 0.1)
    p['time_kkk_w1'] = rnd((C, 24));    p['time_kkk_w2'] = rnd((24, C), 0.1)
    p['gate_w1'] = rnd((C, 120));       p['gate_w2'] = rnd((120, C), 0.1)
    p['ma_w1'] = rnd((C, 24));          p['ma_w2'] = rnd((24, C), 0.1)
    p['time_misc_a'] = rnd((1, 1, C))
    p['mk_w1'] = rnd((C, 24));          p['mk_w2'] = rnd((24, C), 0.1)
    p['time_misc_k'] = rnd((1, 1, C))
    if layer_id != 0:
        p['mv_w1'] = rnd((C, 24));      p['mv_w2'] = rnd((24, C), 0.1)
        p['time_misc_v'] = rnd((1, 1, C)) + 1.0
    # linear weights stored transposed (in, out) so that y = x @ W
    p['receptance_w'] = rnd((C, C), 0.5 / C ** 0.5)
    p['key_w'] = rnd((C, C), 0.05 / C ** 0.5)
    p['value_w'] = rnd((C, C), 0.5 / C ** 0.5)
    p['output_w'] = rnd((C, C), 0.1)   # torch zeros this; random for a non-trivial demo
    p['ln_x_w'] = jnp.ones((C,), jnp.float32)
    p['ln_x_b'] = jnp.zeros((C,), jnp.float32)
    # channel mix
    smix = jnp.power(ddd, ratio_1_to_almost0).reshape(1, 1, C)
    p['spatial_mix_k'] = smix
    p['spatial_mix_r'] = smix
    hid = 4 * C
    p['mlp_key_w'] = rnd((C, hid), 0.05)
    p['mlp_recept_w'] = rnd((C, C), 0.05)
    p['mlp_value_w'] = rnd((hid, C), 0.05)
    # block
    p['lambdas'] = jnp.array([1.0, 0.0], dtype=jnp.float32)
    p['ln1_w'] = jnp.ones((C,), jnp.float32); p['ln1_b'] = jnp.zeros((C,), jnp.float32)
    p['ln2_w'] = jnp.ones((C,), jnp.float32); p['ln2_b'] = jnp.zeros((C,), jnp.float32)
    return p


if __name__ == "__main__":
    B, C = 2, 64
    n_head = C // HEAD_SIZE            # 2 heads of size 32
    n_layer, layer_id = 4, 1
    res = (8, 8)
    T = res[0] * res[1]

    key = jax.random.PRNGKey(0)
    kx, kv, k0, kp = jax.random.split(key, 4)
    x = jax.random.normal(kx, (B, T, C), dtype=jnp.float32)
    v1 = jax.random.normal(kv, (B, T, C), dtype=jnp.float32)
    x0 = jax.random.normal(k0, (B, T, C), dtype=jnp.float32)
    params = init_params(kp, C, n_head, n_layer, layer_id)

    # --- small matmul sanity check ---
    km = jax.random.split(jax.random.PRNGKey(2), 2)
    am = jax.random.normal(km[0], (40, 24), dtype=jnp.float32)
    bm = jax.random.normal(km[1], (24, 88), dtype=jnp.float32)
    mm = pallas_matmul(am, bm)
    mm_ref = jnp.dot(am.astype(jnp.bfloat16), bm.astype(jnp.bfloat16),
                     preferred_element_type=jnp.float32)
    assert float(jnp.max(jnp.abs(mm - mm_ref))) < 1e-2

    # --- chunked wkv7 kernel vs. sequential reference ---
    kt = jax.random.split(jax.random.PRNGKey(1), 8)
    r_t = jax.random.normal(kt[0], (B, T, C)) * 0.5
    k_t = jax.random.normal(kt[1], (B, T, C)) * 0.5
    v_t = jax.random.normal(kt[2], (B, T, C)) * 0.5
    w_t = -jax.nn.softplus(-jax.random.normal(kt[3], (B, T, C))) - 0.5
    kk_r = jax.random.normal(kt[4], (B, T, C))
    kk4 = kk_r.reshape(B, T, n_head, HEAD_SIZE)
    kk_t = (kk4 / jnp.maximum(jnp.sqrt(jnp.sum(kk4 * kk4, -1, keepdims=True)),
                              1e-12)).reshape(B, T, C)
    ag_t = jax.nn.sigmoid(jax.random.normal(kt[5], (B, T, C)))
    gnw = 1.0 + 0.1 * jax.random.normal(kt[6], (C,))
    gnb = 0.1 * jax.random.normal(kt[7], (C,))
    fa = 0.1 * jax.random.normal(kt[0], (1, 1, n_head, HEAD_SIZE))
    out_k = wkv7_ln_bonus(r_t, w_t, k_t, v_t, -kk_t, kk_t * ag_t, gnw, gnb, fa, n_head)
    out_r = wkv7_ln_bonus_ref(r_t, w_t, k_t, v_t, -kk_t, kk_t * ag_t, gnw, gnb, fa, n_head)
    err = float(jnp.max(jnp.abs(out_k - out_r)))
    assert err < 3e-2, f"wkv7 chunked kernel mismatch: max abs err {err}"

    # --- full block forward ---
    scan = (SCAN_FORWARD,)
    fwd = jax.jit(functools.partial(rwkv7_block_forward, res=res, scan=scan,
                                    layer_id=layer_id, n_head=n_head))
    out_x, out_v1 = fwd(params, x, v1, x0)
    jax.block_until_ready((out_x, out_v1))
    assert out_x.shape == (B, T, C) and out_v1.shape == (B, T, C)
    assert bool(jnp.all(jnp.isfinite(out_x))) and bool(jnp.all(jnp.isfinite(out_v1)))
    print("KERNEL_OK")
</pallas_src>

<mosaic_0001>
module attributes {stable_mosaic.version = 11 : i64} {
  func.func @_matmul_kernel(%arg0: i32, %arg1: i32, %arg2: i32, %arg3: memref<40x24xbf16, #tpu.memory_space<vmem>>, %arg4: memref<24x88xbf16, #tpu.memory_space<vmem>>, %arg5: memref<40x88xf32, #tpu.memory_space<vmem>>, %arg6: memref<40x88xf32, #tpu.memory_space<vmem>>) attributes {dimension_semantics = [#tpu.dimension_semantics<parallel>, #tpu.dimension_semantics<parallel>, #tpu.dimension_semantics<arbitrary>], iteration_bounds = array<i64: 1, 1, 1>, scalar_prefetch = 0 : i64, scratch_operands = 1 : i64, tpu.core_type = #tpu.core_type<tc>, window_params = [{transform_indices = @transform_0, window_bounds = array<i64: 40, 24>}, {transform_indices = @transform_1, window_bounds = array<i64: 24, 88>}, {transform_indices = @transform_2, window_bounds = array<i64: 40, 88>}]} {
    %c0_i32 = arith.constant 0 : i32
    %0 = arith.cmpi eq, %arg2, %c0_i32 : i32
    %1 = arith.extui %0 : i1 to i32
    %c0_i32_0 = arith.constant 0 : i32
    %2 = arith.cmpi ne, %1, %c0_i32_0 : i32
    scf.if %2 {
      %cst_10 = arith.constant 0.000000e+00 : f32
      %12 = vector.broadcast %cst_10 : f32 to vector<40x88xf32>
      %c0_11 = arith.constant 0 : index
      %c0_12 = arith.constant 0 : index
      %13 = vector.load %arg6[%c0_11, %c0_12] : memref<40x88xf32, #tpu.memory_space<vmem>>, vector<40x88xf32>
      tpu.vector_store %arg6[%c0_11, %c0_12], %12 {strides = array<i32>} : memref<40x88xf32, #tpu.memory_space<vmem>>, vector<40x88xf32>,
    } else {
    }
    %c0 = arith.constant 0 : index
    %c0_1 = arith.constant 0 : index
    %3 = vector.load %arg6[%c0, %c0_1] : memref<40x88xf32, #tpu.memory_space<vmem>>, vector<40x88xf32>
    %c0_2 = arith.constant 0 : index
    %c0_3 = arith.constant 0 : index
    %4 = vector.load %arg3[%c0_2, %c0_3] : memref<40x24xbf16, #tpu.memory_space<vmem>>, vector<40x24xbf16>
    %c0_4 = arith.constant 0 : index
    %c0_5 = arith.constant 0 : index
    %5 = vector.load %arg4[%c0_4, %c0_5] : memref<24x88xbf16, #tpu.memory_space<vmem>>, vector<24x88xbf16>
    %cst = arith.constant dense<0.000000e+00> : vector<40x88xf32>
    %6 = tpu.matmul %4, %5, %cst {dimension_numbers = #tpu.dot_dimension_numbers<[1], [0], [0], [1], [0, 0, 1, 1], [], []>} : vector<40x24xbf16>, vector<24x88xbf16>, vector<40x88xf32> -> vector<40x88xf32>
    %7 = arith.addf %3, %6 : vector<40x88xf32>
    %c0_6 = arith.constant 0 : index
    %c0_7 = arith.constant 0 : index
    %8 = vector.load %arg6[%c0_6, %c0_7] : memref<40x88xf32, #tpu.memory_space<vmem>>, vector<40x88xf32>
    tpu.vector_store %arg6[%c0_6, %c0_7], %7 {strides = array<i32>} : memref<40x88xf32, #tpu.memory_space<vmem>>, vector<40x88xf32>,
    %c0_i32_8 = arith.constant 0 : i32
    %9 = arith.cmpi eq, %arg2, %c0_i32_8 : i32
    %10 = arith.extui %9 : i1 to i32
    %c0_i32_9 = arith.constant 0 : i32
    %11 = arith.cmpi ne, %10, %c0_i32_9 : i32
    scf.if %11 {
      %c0_10 = arith.constant 0 : index
      %c0_11 = arith.constant 0 : index
      %12 = vector.load %arg6[%c0_10, %c0_11] : memref<40x88xf32, #tpu.memory_space<vmem>>, vector<40x88xf32>
      %c0_12 = arith.constant 0 : index
      %c0_13 = arith.constant 0 : index
      %13 = vector.load %arg5[%c0_12, %c0_13] : memref<40x88xf32, #tpu.memory_space<vmem>>, vector<40x88xf32>
      tpu.vector_store %arg5[%c0_12, %c0_13], %12 {strides = array<i32>} : memref<40x88xf32, #tpu.memory_space<vmem>>, vector<40x88xf32>,
    } else {
    }
    return
  }
  func.func @transform_0(%arg0: i32, %arg1: i32, %arg2: i32) -> (i32, i32) {
    %c0_i32 = arith.constant 0 : i32
    return %arg0, %arg2 : i32, i32
  }
  func.func @transform_1(%arg0: i32, %arg1: i32, %arg2: i32) -> (i32, i32) {
    %c0_i32 = arith.constant 0 : i32
    return %arg2, %arg1 : i32, i32
  }
  func.func @transform_2(%arg0: i32, %arg1: i32, %arg2: i32) -> (i32, i32) {
    %c0_i32 = arith.constant 0 : i32
    return %arg0, %arg1 : i32, i32
  }
}

</mosaic_0001>

<bundles_post_ra>
// kernel: tpu_custom_call.1
= control target key start
LH: loop header
LB: loop body
LE: loop exit
PB: predicated region body
PF: predicated region fallthrough
CT: control target
= control target key end

     0   :  { %v235_v1 = vmov 0.0   ;;  %vm68_vm0 = vcmask 1043456   ;;  %vm236_vm1 = vmmov 0   ;;  %vm17_vm2 = vcmask 719872   ;;  %s300_s0 = inlined_call_operand.vmem [shape: bf16[40,24], index: 0, kind: input, shape index: {}]   ;;  %s301_s1 = inlined_call_operand.vmem [shape: bf16[24,88], index: 1, kind: input, shape index: {}]   ;;  %s302_s2 = inlined_call_operand.hbm [shape: f32[40,88], index: 2, kind: output, shape index: {}]  }
   0x1   :  { %v206_v0 = vld [vmem:[%s301_s1] sm:$0xff]   ;;  %197 = vmatprep.subr.bf16.mxu1 %v235_v1  ;;  %181 = vmatprep.subr.bf16.mxu0 %v235_v1  ;;  %v207_v2 = vld [vmem:[%s301_s1 + $0x8] ss:$0 sps:$4 sm:$0xff]   ;;  %20 = vst.msk [vmem:[#allocation2 + $0x10] sm:$0xff] %vm17_vm2, %v235_v1  ;;  %18 = vst.msk [vmem:[#allocation2] sm:$0xff] %vm17_vm2, %v235_v1 }
   0x2   :  { %199 = vmatpush3.bf16.msra.mxu1 %v206_v0  ;;  %182 = vmatpush3.bf16.msra.mxu0 %v206_v0  ;;  %v70_v3 = vsel %vm68_vm0, %v207_v2, 0  ;;  %v208_v4 = vld [vmem:[%s300_s0 + $0x8] sm:$0xff]   ;;  %v209_v5 = vld [vmem:[%s300_s0] sm:$0xff]   ;;  %19 = vst.msk [vmem:[#allocation2 + $0x8] sm:$0xff] %vm17_vm2, %v235_v1  ;;  %21 = vst.msk [vmem:[#allocation2 + $0x18] sm:$0xff] %vm17_vm2, %v235_v1 }
   0x3   :  { %198 = vmatprep.subr.bf16.mxu1 %v235_v1  ;;  %183 = vmatprep.subr.bf16.mxu0 %v235_v1  ;;  %22 = vst.msk [vmem:[#allocation2 + $0x20] sm:$0xff] %vm17_vm2, %v235_v1 }
   0x4   :  { %189 = vmatprep.mubr.msk.bf16.mxu1 %vm236_vm1, %v235_v1  ;;  %185 = vmatprep.mubr.msk.bf16.mxu0 %vm236_vm1, %v235_v1 }
   0x5   :  { %7 = vsyncpa [#allocation4], 0  ;;  %vm58_vm3 = vcmask 195584   ;;  %v210_v6 = vld [vmem:[%s300_s0 + $0x10] ss:$0 sps:$4 sm:$0xff]   ;;  %s237_s0 = smov [#allocation3]  }
   0x6   :  { %200 = vmatpush3.bf16.msra.mxu1 %v70_v3  ;;  %184 = vmatpush3.bf16.msra.mxu0 %v70_v3  ;;  %s157_s18 = sshll.u32 %s237_s0, 4  ;;  %s158_s18 = int_to_ptr.vmem [resolvable:$true] %s157_s18 }
   0x7   :  { %s211_s19 = scalar_lea.vmem %s158_s18, 640  ;;  %p216_p1 = scmp.lt.s32.totalorder %s158_s18, %s158_s18 }
   0x8   :  { %v25_v7 = vld [vmem:[#allocation2 + $0x10] sm:$0xff]  ;;  %v23_v8 = vld [vmem:[#allocation2] sm:$0xff]  ;;  %p212_p0 = scmp.ne.s32.totalorder %s158_s18, %s211_s19  ;;  %p217_p2 = scmp.lt.s32.totalorder %s211_s19, %s211_s19 }
   0x9   :  { %190 = vmatmul.mubr.msk.bf16.vlgmr.msra.gmra.mrb[0].mxu1 %vm58_vm3, %v208_v4  ;;  %186 = vmatmul.mubr.msk.bf16.vlgmr.msra.gmra.mrb[0].mxu0 %vm58_vm3, %v209_v5  ;;  %v26_v10 = vld [vmem:[#allocation2 + $0x18] sm:$0xff]  ;;  %v24_v12 = vld [vmem:[#allocation2 + $0x8] sm:$0xff] }
   0xa   :  { %193 = vmatprep.mubr.msk.bf16.mxu1 %vm236_vm1, %v235_v1  ;;  %v27_v23 = vld [vmem:[#allocation2 + $0x20] sm:$0xff]  ;;  %p218_p3 = por %p217_p2, %p216_p1 }
   0xc   :  { %p219_p4 = pnand %p218_p3, %p212_p0 }
  0x11   :  { %194 = vmatmul.mubr.msk.bf16.gmra.mrb[4].mxu1 %vm58_vm3, %v210_v6 }
  0xdc   :  { %v114_v9 = vpop.f32.mrb[0].mxu1  ;;  %v106_v11 = vpop.f32.mrb[0].mxu0 }
  0xdd   :  { %v130_v13 = vadd.f32 %v114_v9, %v25_v7  ;;  %v191_v14 = vpop.f32.mrb[1].mxu1  ;;  %v128_v15 = vadd.f32 %v106_v11, %v23_v8  ;;  %v187_v16 = vpop.f32.mrb[1].mxu0 }
  0xde   :  { %v117_v17 = vpop.f32.mrb[2].mxu1  ;;  %v109_v18 = vpop.f32.mrb[2].mxu0 }
  0xdf   :  { %136 = vst.msk [vmem:[#allocation2 + $0x10] sm:$0xff] %vm17_vm2, %v130_v13  ;;  %v131_v19 = vadd.f32 %v117_v17, %v26_v10  ;;  %134 = vst.msk [vmem:[#allocation2] sm:$0xff] %vm17_vm2, %v128_v15  ;;  %v192_v20 = vpop.f32.mrb[3].mxu1  ;;  %v129_v21 = vadd.f32 %v109_v18, %v24_v12  ;;  %v188_v22 = vpop.f32.mrb[3].mxu0 }
  0xe1   :  { %137 = vst.msk [vmem:[#allocation2 + $0x18] sm:$0xff] %vm17_vm2, %v131_v19  ;;  %135 = vst.msk [vmem:[#allocation2 + $0x8] sm:$0xff] %vm17_vm2, %v129_v21 }
  0xe4   :  { %v122_v24 = vpop.f32.mrb[4].mxu1 }
  0xe5   :  { %v132_v25 = vadd.f32 %v122_v24, %v27_v23  ;;  %v195_v26 = vpop.f32.mrb[5].mxu1 }
  0xe6   :  { %v125_v27 = vpop.f32.mrb[6].mxu1  ;;  %v142_v28 = vld [vmem:[#allocation2] sm:$0xff]  ;;  %v144_v29 = vld [vmem:[#allocation2 + $0x10] sm:$0xff] }
  0xe7   :  { %138 = vst.msk [vmem:[#allocation2 + $0x20] sm:$0xff] %vm17_vm2, %v132_v25  ;;  %v196_v30 = vpop.f32.mrb[7].mxu1  ;;  %147 = vst.msk [vmem:[#allocation3] sm:$0xff] %vm17_vm2, %v142_v28 }
  0xe8   :  { %149 = vst.msk [vmem:[#allocation3 + $0x10] sm:$0xff] %vm17_vm2, %v144_v29  ;;  %v143_v31 = vld [vmem:[#allocation2 + $0x8] sm:$0xff]  ;;  %v145_v32 = vld [vmem:[#allocation2 + $0x18] sm:$0xff] }
  0xe9   :  { %148 = vst.msk [vmem:[#allocation3 + $0x8] sm:$0xff] %vm17_vm2, %v143_v31  ;;  %150 = vst.msk [vmem:[#allocation3 + $0x18] sm:$0xff] %vm17_vm2, %v145_v32 }
  0xee   :  { %v146_v33 = vld [vmem:[#allocation2 + $0x20] sm:$0xff] }
  0xef   :  { %151 = vst.msk [vmem:[#allocation3 + $0x20] sm:$0xff] %vm17_vm2, %v146_v33 }
  0xf0   :  { %222 = shalt.err (!%p219_p4)
}
  0xf1   :  { %s223_s22 = scalar_lea.hbm %s302_s2, 640 }
  0xf2   :  { %p224_p5 = scmp.ne.s32.totalorder %s302_s2, %s223_s22  ;;  %p227_p6 = scmp.lt.u32.totalorder %s223_s22, %s302_s2 }
  0xf4   :  { %p229_p7 = pnand %p227_p6, %p224_p5 }
  0xf6   :  { %232 = shalt.err (!%p229_p7)
}
  0xf7   :  { %s238_s27 = smov 128   ;;  %s239_s28 = smov 8  }
  0xf8   :  { %163 = dma.vmem_to_hbm [thread:$0]  %s158_s18, 640, %s302_s2, [#allocation4], %s238_s27, %s238_s27, %s239_s28  }
  0xf9   :  { %233 = dma.done.wait [#allocation4], 640  }
  0xfa   :  { %234 = vsyncadd [#allocation4], 4294966656 }
  0xfb   :  { %167 = vsyncpa [#allocation4], 1 }

</bundles_post_ra>
